<compile_context>
chip_gen: v7x
topology: tpu7x:2x2x1
jax: 0.10.0
libtpu: 0.0.40
codegen_flags: <defaults>
</compile_context>

<pallas_src>
import jax
import jax.numpy as jnp
from jax.experimental import pallas as pl
from jax.experimental.pallas import tpu as pltpu


def _addition_loss_kernel(logits_ref, tgt_ref, out_ref):
    # logits_ref : (V, TN) logits (native dtype) — vocab on sublanes, flattened
    #              batch*seq tokens on lanes.
    # tgt_ref    : (1, TN) int32 targets (same lane axis).
    # out_ref    : (2, TN) float32; row 0 = per-token -log(p_target + 1e-10),
    #                               row 1 = per-token (argmax == target) flag.
    logits = logits_ref[...].astype(jnp.float32)              # upcast in-kernel
    tgt = tgt_ref[...]                                         # (1, TN)
    V, TN = logits.shape

    # Sublane reductions over the small vocab axis.
    m = jnp.max(logits, axis=0, keepdims=True)                 # (1, TN)
    e = jnp.exp(logits - m)                                    # (V, TN)  (EUP)
    sumexp = jnp.sum(e, axis=0, keepdims=True)                 # (1, TN)

    row = jax.lax.broadcasted_iota(jnp.int32, (V, TN), 0)      # vocab idx/sublane
    tgt_mask = row == tgt                                      # (V, TN)

    # Gather exp(logit_target - m) per token (single nonzero summed), then log
    # only on the (1, TN) target probabilities — matches log(softmax + 1e-10).
    e_t = jnp.sum(jnp.where(tgt_mask, e, jnp.float32(0.0)),
                  axis=0, keepdims=True)                       # (1, TN)
    prob_t = e_t / sumexp
    nll = -jnp.log(prob_t + jnp.float32(1e-10))                # (1, TN)

    # First-max-index argmax directly on logits (matches jnp/torch argmax
    # first-occurrence semantics; softmax is monotone so the argmax agrees).
    is_max = logits == m
    pred = jnp.min(jnp.where(is_max, row, jnp.int32(V)),
                   axis=0, keepdims=True)                      # (1, TN) int32
    correct = (pred == tgt).astype(jnp.float32)                # (1, TN)

    out_ref[0:1, :] = nll
    out_ref[1:2, :] = correct


def _round_up(x, m):
    return ((x + m - 1) // m) * m


def _pick_tn(N, V, itemsize, budget_bytes=24 << 20):
    """Largest lane-tile (multiple of 128) whose *padded*, double-buffered VMEM
    footprint stays under budget, preferring >= 2 grid steps (v7x dual-TC)."""
    # Sublane packing multiple for the logits dtype (8 f32 / 16 bf16 / 32 int8).
    sub = {4: 8, 2: 16, 1: 32}.get(int(itemsize), 8)
    v_pad = _round_up(max(V, 1), sub)
    # Per lane column per grid step, double-buffered streams:
    #   logits : 2 * v_pad * itemsize
    #   target : 2 * 8 * 4    ((1, TN) int32 pads to 8 sublanes)
    #   output : 2 * 8 * 4    ((2, TN) f32 pads to 8 sublanes)
    bytes_per_lane = 2 * (v_pad * int(itemsize) + 8 * 4 + 8 * 4)
    cap_tn = max(128, (budget_bytes // bytes_per_lane) // 128 * 128)
    # Prefer at least 2 grid steps when there is enough work.
    half_tn = _round_up(max(1, -(-N // 2)), 128)
    return int(min(cap_tn, half_tn))


def addition_loss(outputs: jax.Array, target: jax.Array):
    """outputs: [B, S, V] float logits; target: [B, S] int -> (loss, match_rate)."""
    B, S, V = outputs.shape
    N = B * S

    # Lane-dense layout: vocab on sublanes, flattened tokens on lanes.
    logits_vn = jnp.transpose(outputs.reshape(N, V))           # (V, N), native dtype
    tgt_row = target.astype(jnp.int32).reshape(1, N)           # (1, N)

    tn = _pick_tn(N, V, outputs.dtype.itemsize)
    n_pad = _round_up(N, tn)
    if n_pad != N:
        logits_vn = jnp.pad(logits_vn, ((0, 0), (0, n_pad - N)))
        tgt_row = jnp.pad(tgt_row, ((0, 0), (0, n_pad - N)))
    nb = n_pad // tn

    grid_spec = pltpu.PrefetchScalarGridSpec(
        num_scalar_prefetch=0,
        grid=(nb,),
        in_specs=[
            pl.BlockSpec((V, tn), lambda i: (0, i)),   # full vocab, lane tile
            pl.BlockSpec((1, tn), lambda i: (0, i)),   # targets on same lanes
        ],
        out_specs=pl.BlockSpec((2, tn), lambda i: (0, i)),
    )

    per_tok = pl.pallas_call(
        _addition_loss_kernel,
        out_shape=jax.ShapeDtypeStruct((2, n_pad), jnp.float32),
        grid_spec=grid_spec,
        compiler_params=pltpu.CompilerParams(
            dimension_semantics=("parallel",),   # each step writes its own block
            vmem_limit_bytes=48 << 20,           # > v5e/v6e defaults, < v7x physical
        ),
    )(logits_vn, tgt_row)

    # Tiny O(B*S) reductions in the wrapper (drop lane padding first).
    per_tok = per_tok[:, :N]
    loss = jnp.sum(per_tok[0]) / jnp.float32(B)
    correct = per_tok[1].reshape(B, S)
    exact = jnp.all(correct > jnp.float32(0.5), axis=1).astype(jnp.float32)
    match_rate = jnp.mean(exact)
    return loss, match_rate


def _reference(outputs, target):
    B = outputs.shape[0]
    V = outputs.shape[-1]
    preds = jax.nn.softmax(outputs.astype(jnp.float32), axis=-1)
    onehot = jax.nn.one_hot(target, V, dtype=jnp.float32)
    loss = -jnp.sum(onehot * jnp.log(preds + 1e-10)) / B
    pred_digits = jnp.argmax(preds, axis=-1)
    exact = jnp.all(pred_digits == target, axis=1).astype(jnp.float32)
    return loss, jnp.mean(exact)


if __name__ == "__main__":
    key = jax.random.PRNGKey(0)
    k1, k2 = jax.random.split(key)
    B, S, V = 2, 8, 16
    outputs = jax.random.normal(k1, (B, S, V), dtype=jnp.float32)
    target = jax.random.randint(k2, (B, S), 0, V, dtype=jnp.int32)

    loss, match_rate = addition_loss(outputs, target)
    jax.block_until_ready((loss, match_rate))

    ref_loss, ref_match = _reference(outputs, target)
    assert jnp.allclose(loss, ref_loss, rtol=1e-5, atol=1e-5), (loss, ref_loss)
    assert jnp.allclose(match_rate, ref_match), (match_rate, ref_match)

    print("KERNEL_OK")
</pallas_src>

<mosaic_0001>
module attributes {stable_mosaic.version = 11 : i64} {
  func.func @_addition_loss_kernel(%arg0: i32, %arg1: memref<16x128xf32, #tpu.memory_space<vmem>>, %arg2: memref<1x128xi32, #tpu.memory_space<vmem>>, %arg3: memref<2x128xf32, #tpu.memory_space<vmem>>) attributes {dimension_semantics = [#tpu.dimension_semantics<parallel>], iteration_bounds = array<i64: 1>, scalar_prefetch = 0 : i64, scratch_operands = 0 : i64, tpu.core_type = #tpu.core_type<tc>, window_params = [{transform_indices = @transform_0, window_bounds = array<i64: 16, 128>}, {transform_indices = @transform_1, window_bounds = array<i64: 1, 128>}, {transform_indices = @transform_2, window_bounds = array<i64: 2, 128>}]} {
    %c0 = arith.constant 0 : index
    %c0_0 = arith.constant 0 : index
    %0 = vector.load %arg1[%c0, %c0_0] : memref<16x128xf32, #tpu.memory_space<vmem>>, vector<16x128xf32>
    %c0_1 = arith.constant 0 : index
    %c0_2 = arith.constant 0 : index
    %1 = vector.load %arg2[%c0_1, %c0_2] : memref<1x128xi32, #tpu.memory_space<vmem>>, vector<1x128xi32>
    %cst = arith.constant dense<0xFF800000> : vector<128xf32>
    %2 = vector.multi_reduction <maximumf>, %0, %cst [0] : vector<16x128xf32> to vector<128xf32>
    %3 = vector.shape_cast %2 : vector<128xf32> to vector<1x128xf32>
    %4 = vector.broadcast %3 : vector<1x128xf32> to vector<16x128xf32>
    %5 = arith.subf %0, %4 : vector<16x128xf32>
    %6 = math.exp %5 : vector<16x128xf32>
    %cst_3 = arith.constant dense<0.000000e+00> : vector<128xf32>
    %7 = vector.multi_reduction <add>, %6, %cst_3 [0] : vector<16x128xf32> to vector<128xf32>
    %8 = vector.shape_cast %7 : vector<128xf32> to vector<1x128xf32>
    %9 = tpu.iota {dimensions = array<i32: 0>} : vector<16x128xi32>
    %10 = vector.broadcast %1 : vector<1x128xi32> to vector<16x128xi32>
    %11 = arith.cmpi eq, %9, %10 : vector<16x128xi32>
    %cst_4 = arith.constant 0.000000e+00 : f32
    %12 = vector.broadcast %cst_4 : f32 to vector<16x128xf32>
    %13 = arith.select %11, %6, %12 : vector<16x128xi1>, vector<16x128xf32>
    %cst_5 = arith.constant dense<0.000000e+00> : vector<128xf32>
    %14 = vector.multi_reduction <add>, %13, %cst_5 [0] : vector<16x128xf32> to vector<128xf32>
    %15 = vector.shape_cast %14 : vector<128xf32> to vector<1x128xf32>
    %16 = arith.divf %15, %8 : vector<1x128xf32>
    %cst_6 = arith.constant 1.000000e-10 : f32
    %17 = vector.broadcast %cst_6 : f32 to vector<1x128xf32>
    %18 = arith.addf %16, %17 : vector<1x128xf32>
    %19 = math.log %18 : vector<1x128xf32>
    %cst_7 = arith.constant 0.000000e+00 : f32
    %20 = vector.broadcast %cst_7 : f32 to vector<1x128xf32>
    %21 = arith.subf %20, %19 : vector<1x128xf32>
    %22 = vector.broadcast %3 : vector<1x128xf32> to vector<16x128xf32>
    %23 = arith.cmpf oeq, %0, %22 : vector<16x128xf32>
    %c16_i32 = arith.constant 16 : i32
    %24 = vector.broadcast %c16_i32 : i32 to vector<16x128xi32>
    %25 = arith.select %23, %9, %24 : vector<16x128xi1>, vector<16x128xi32>
    %cst_8 = arith.constant dense<2147483647> : vector<128xi32>
    %26 = vector.multi_reduction <minsi>, %25, %cst_8 [0] : vector<16x128xi32> to vector<128xi32>
    %27 = vector.shape_cast %26 : vector<128xi32> to vector<1x128xi32>
    %28 = arith.cmpi eq, %27, %1 : vector<1x128xi32>
    %29 = arith.extui %28 : vector<1x128xi1> to vector<1x128xi32>
    %30 = arith.sitofp %29 : vector<1x128xi32> to vector<1x128xf32>
    %c0_9 = arith.constant 0 : index
    %c0_10 = arith.constant 0 : index
    %31 = vector.load %arg3[%c0_9, %c0_10] : memref<2x128xf32, #tpu.memory_space<vmem>>, vector<1x128xf32>
    tpu.vector_store %arg3[%c0_9, %c0_10], %21 {strides = array<i32>} : memref<2x128xf32, #tpu.memory_space<vmem>>, vector<1x128xf32>,
    %c1 = arith.constant 1 : index
    %c0_11 = arith.constant 0 : index
    %32 = vector.load %arg3[%c1, %c0_11] : memref<2x128xf32, #tpu.memory_space<vmem>>, vector<1x128xf32>
    tpu.vector_store %arg3[%c1, %c0_11], %30 {strides = array<i32>} : memref<2x128xf32, #tpu.memory_space<vmem>>, vector<1x128xf32>,
    return
  }
  func.func @transform_0(%arg0: i32) -> (i32, i32) {
    %c0_i32 = arith.constant 0 : i32
    %c0_i32_0 = arith.constant 0 : i32
    return %c0_i32, %arg0 : i32, i32
  }
  func.func @transform_1(%arg0: i32) -> (i32, i32) {
    %c0_i32 = arith.constant 0 : i32
    %c0_i32_0 = arith.constant 0 : i32
    return %c0_i32, %arg0 : i32, i32
  }
  func.func @transform_2(%arg0: i32) -> (i32, i32) {
    %c0_i32 = arith.constant 0 : i32
    %c0_i32_0 = arith.constant 0 : i32
    return %c0_i32, %arg0 : i32, i32
  }
}

</mosaic_0001>

<bundles_post_ra>
// kernel: tpu_custom_call.1
= control target key start
LH: loop header
LB: loop body
LE: loop exit
PB: predicated region body
PF: predicated region fallthrough
CT: control target
= control target key end

     0   :  { %7 = vsyncpa [#allocation3], 0  ;;  %s217_s0 = inlined_call_operand.hbm [shape: f32[16,128], index: 0, kind: input, shape index: {}]   ;;  %s218_s1 = inlined_call_operand.vmem [shape: s32[1,128], index: 1, kind: input, shape index: {}]   ;;  %s219_s2 = inlined_call_operand.hbm [shape: f32[2,128], index: 2, kind: output, shape index: {}]  }
   0x1   :  { %8 = vsyncpa [#allocation4], 0  ;;  %s170_s9 = smov [#allocation2]   ;;  %s122_s13 = scalar_lea.hbm %s217_s0, 256 }
   0x2   :  { %s14_s10 = sshll.u32 %s170_s9, 4  ;;  %p123_p0 = scmp.ne.s32.totalorder %s217_s0, %s122_s13  ;;  %s15_s10 = int_to_ptr.vmem [resolvable:$true] %s14_s10 }
   0x3   :  { %p126_p1 = scmp.lt.u32.totalorder %s122_s13, %s217_s0 }
   0x5   :  { %p128_p2 = pnand %p126_p1, %p123_p0 }
   0x7   :  { %131 = shalt.err (!%p128_p2)
}
   0x8   :  { %s132_s18 = scalar_lea.vmem %s15_s10, 256  ;;  %p137_p4 = scmp.lt.s32.totalorder %s15_s10, %s15_s10 }
   0x9   :  { %p133_p3 = scmp.ne.s32.totalorder %s15_s10, %s132_s18  ;;  %p138_p5 = scmp.lt.s32.totalorder %s132_s18, %s132_s18 }
   0xb   :  { %p139_p6 = por %p138_p5, %p137_p4 }
   0xd   :  { %p140_p7 = pnand %p139_p6, %p133_p3 }
   0xf   :  { %143 = shalt.err (!%p140_p7)
}
  0x10   :  { %s171_s19 = smov 128   ;;  %s172_s20 = smov 8  }
  0x11   :  { %20 = dma.hbm_to_vmem [thread:$0]  %s217_s0, 256, %s15_s10, [#allocation3], %s171_s19, %s171_s19, %s172_s20  }
  0x12   :  { %166 = dma.done.wait [#allocation3], 256  }
  0x13   :  { %167 = vsyncadd [#allocation3], 4294967040  ;;  %v26_v0 = vld [vmem:[#allocation2] sm:$0xff]  ;;  %v27_v1 = vld [vmem:[#allocation2 + $0x8] sm:$0xff]  ;;  %v49_v6 = vlaneseq  ;;  %v173_v34 = vmov 0.0  }
  0x14   :  { %v29_v2 = vmax.f32 %v26_v0, %v27_v1  ;;  %v28_v21 = vld [vmem:[%s218_s1] sm:$0x1]  ;;  %s174_s1 = smov [#allocation5]  }
  0x15   :  { %v50_v9 = vshrl.u32 %v49_v6, 7  ;;  %s99_s24 = sshll.u32 %s174_s1, 4  ;;  %s100_s24 = int_to_ptr.vmem [resolvable:$true] %s99_s24 }
  0x16   :  { %v30_v3 = vrot.slane %v29_v2, 4  ;;  %s144_s25 = scalar_lea.vmem %s100_s24, 32  ;;  %p149_p9 = scmp.lt.s32.totalorder %s100_s24, %s100_s24 }
  0x17   :  { %v51_v11 = vadd.s32 8, %v50_v9  ;;  %v54_v19 = vsub.s32 0, %v50_v9  ;;  %p145_p8 = scmp.ne.s32.totalorder %s100_s24, %s144_s25  ;;  %p150_p10 = scmp.lt.s32.totalorder %s144_s25, %s144_s25 }
  0x18   :  { %v31_v4 = vmax.f32 %v29_v2, %v30_v3 }
  0x19   :  { %v55_v23 = vrot.slane %v28_v21, %v54_v19  ;;  %p151_p11 = por %p150_p10, %p149_p9 }
  0x1a   :  { %v32_v5 = vrot.slane %v31_v4, 2 }
  0x1b   :  { %vm56_vm5 = vcmp.eq.s32.totalorder %v50_v9, %v55_v23  ;;  %vm57_vm6 = vcmp.eq.s32.totalorder %v51_v11, %v55_v23  ;;  %p152_p12 = pnand %p151_p11, %p145_p8 }
  0x1c   :  { %v33_v7 = vmax.f32 %v31_v4, %v32_v5 }
  0x1e   :  { %v34_v8 = vrot.slane %v33_v7, 1 }
  0x20   :  { %v35_v10 = vmax.f32 %v33_v7, %v34_v8 }
  0x22   :  { %v36_v12 = vsub.f32 %v26_v0, %v35_v10  ;;  %v37_v13 = vsub.f32 %v27_v1, %v35_v10  ;;  %vm73_vm0 = vcmp.eq.f32.partialorder %v26_v0, %v35_v10  ;;  %vm74_vm1 = vcmp.eq.f32.partialorder %v27_v1, %v35_v10 }
  0x23   :  { %v75_v14 = vsel %vm73_vm0, %v50_v9, 16  ;;  %v76_v15 = vsel %vm74_vm1, %v51_v11, 16 }
  0x24   :  { %v38_v16 = vmul.f32 1.442695, %v36_v12  ;;  %v40_v17 = vmul.f32 1.442695, %v37_v13  ;;  %vm77_vm2 = vcmp.lt.s32.totalorder %v75_v14, %v76_v15 }
  0x25   :  { %v78_v18 = vsel %vm77_vm2, %v75_v14, %v76_v15 }
  0x26   :  { %114 = vpow2.f32 %v38_v16  ;;  %v79_v20 = vrot.slane %v78_v18, 4 }
  0x27   :  { %116 = vpow2.f32 %v40_v17 }
  0x28   :  { %vm80_vm3 = vcmp.lt.s32.totalorder %v78_v18, %v79_v20 }
  0x29   :  { %v81_v22 = vsel %vm80_vm3, %v78_v18, %v79_v20 }
  0x2a   :  { %v82_v24 = vrot.slane %v81_v22, 2 }
  0x2c   :  { %vm83_vm4 = vcmp.lt.s32.totalorder %v81_v22, %v82_v24 }
  0x2d   :  { %v84_v25 = vsel %vm83_vm4, %v81_v22, %v82_v24 }
  0x2e   :  { %v85_v26 = vrot.slane %v84_v25, 1 }
  0x30   :  { %v115_v27 = vpop.eup %114  ;;  %vm86_vm7 = vcmp.lt.s32.totalorder %v84_v25, %v85_v26 }
  0x31   :  { %v117_v28 = vpop.eup %116  ;;  %v58_v29 = vsel %vm56_vm5, %v115_v27, 0.0  ;;  %v87_v30 = vsel %vm86_vm7, %v84_v25, %v85_v26 }
  0x32   :  { %v42_v31 = vadd.f32 %v117_v28, %v115_v27  ;;  %v59_v32 = vsel %vm57_vm6, %v117_v28, 0.0  ;;  %vm88_vm8 = vcmp.eq.s32.totalorder %v87_v30, %v28_v21 }
  0x33   :  { %v60_v33 = vadd.f32 %v59_v32, %v58_v29  ;;  %v108_v35 = vsel %vm88_vm8, 1.0, %v173_v34 }
  0x34   :  { %v43_v36 = vrot.slane %v42_v31, 4  ;;  %92 = vst [vmem:[#allocation5 + $0x1] sm:$0x1] %v108_v35 }
  0x35   :  { %v61_v37 = vrot.slane %v60_v33, 4 }
  0x36   :  { %v44_v38 = vadd.f32 %v43_v36, %v42_v31 }
  0x37   :  { %v62_v39 = vadd.f32 %v61_v37, %v60_v33 }
  0x38   :  { %v45_v40 = vrot.slane %v44_v38, 2 }
  0x39   :  { %v63_v42 = vrot.slane %v62_v39, 2 }
  0x3a   :  { %v46_v41 = vadd.f32 %v45_v40, %v44_v38 }
  0x3b   :  { %v64_v45 = vadd.f32 %v63_v42, %v62_v39 }
  0x3c   :  { %v47_v43 = vrot.slane %v46_v41, 1 }
  0x3d   :  { %v65_v46 = vrot.slane %v64_v45, 1 }
  0x3e   :  { %v48_v44 = vadd.f32 %v47_v43, %v46_v41 }
  0x3f   :  { %v66_v47 = vadd.f32 %v65_v46, %v64_v45 }
  0x40   :  { %118 = vrcp.f32 %v48_v44 }
  0x4a   :  { %v119_v48 = vpop.eup %118 }
  0x4b   :  { %v68_v49 = vmul.f32 %v119_v48, %v66_v47 }
  0x4d   :  { %v69_v50 = vadd.f32 1e-10, %v68_v49 }
  0x4f   :  { %120 = vlog2.f32 %v69_v50 }
  0x59   :  { %v121_v51 = vpop.eup %120 }
  0x5a   :  { %v71_v52 = vmul.f32 0.6931472, %v121_v51 }
  0x5c   :  { %v72_v53 = vsub.f32 0.0, %v71_v52 }
  0x5e   :  { %91 = vst [vmem:[#allocation5] sm:$0x1] %v72_v53 }
  0x5f   :  { %155 = shalt.err (!%p152_p12)
}
  0x60   :  { %s156_s28 = scalar_lea.hbm %s219_s2, 32 }
  0x61   :  { %p157_p13 = scmp.ne.s32.totalorder %s219_s2, %s156_s28  ;;  %p160_p0 = scmp.lt.u32.totalorder %s156_s28, %s219_s2 }
  0x63   :  { %p162_p1 = pnand %p160_p0, %p157_p13 }
  0x65   :  { %165 = shalt.err (!%p162_p1)
}
  0x66   :  { %102 = dma.vmem_to_hbm [thread:$0]  %s100_s24, 32, %s219_s2, [#allocation4]  }
  0x67   :  { %168 = dma.done.wait [#allocation4], 32  }
  0x68   :  { %169 = vsyncadd [#allocation4], 4294967264 }
  0x69   :  { %106 = vsyncpa [#allocation3], 1 }
  0x6a   :  { %107 = vsyncpa [#allocation4], 1 }

</bundles_post_ra>
